<compile_context>
chip_gen: v7x
topology: tpu7x:2x2x1
jax: 0.10.0
libtpu: 0.0.40
codegen_flags: <defaults>
</compile_context>

<pallas_src>
import functools

import jax
import jax.numpy as jnp
from jax.experimental import pallas as pl
from jax.experimental.pallas import tpu as pltpu


_VMEM_WEIGHT_BUDGET = 24 * 1024 * 1024   # target for double-buffered weight tiles
_VMEM_LIMIT_BYTES = 48 * 1024 * 1024     # raised scoped-VMEM limit; safe on v5e/v6e/v7x


def _sublane(itemsize):
    """Sublane alignment for a dtype (8 rows f32, 16 bf16, 32 int8/fp8)."""
    return max(8, 32 // max(int(itemsize), 1))


def _fit(dim, target, align):
    """Largest tile <= target that divides `dim` and is a multiple of `align`.
    Falls back to the full dim (a full-extent block is always legal on TPU).
    NOTE: the fallback can produce one large block for awkward (e.g. prime) dims;
    budgets elsewhere are kept conservative so that stays within VMEM."""
    if dim <= target:
        return dim
    t = (min(dim, target) // align) * align
    while t >= align:
        if dim % t == 0:
            return t
        t -= align
    return dim


def _proj_col_tile(K, N, n_mats, itemsize, max_tn=512):
    """Column-tile width so the n_mats double-buffered (K, tn) weight tiles stay
    within the VMEM budget; lane-aligned to 128."""
    tn = _VMEM_WEIGHT_BUDGET // (2 * n_mats * max(K, 1) * itemsize)
    tn = max(128, (tn // 128) * 128)
    return _fit(N, min(tn, max_tn), 128)


# ---------------------------------------------------------------------------
# 1) Fused Q/K/V projection:  q = (x@Wq + bq) * scale,  k = x@Wk + bk,  v = x@Wv + bv
# ---------------------------------------------------------------------------
def _qkv_kernel(x_ref, wq_ref, wk_ref, wv_ref, bq_ref, bk_ref, bv_ref,
                q_ref, k_ref, v_ref, *, scale):
    x = x_ref[...]                                              # (tm, E)
    q = jnp.dot(x, wq_ref[...], preferred_element_type=jnp.float32) + bq_ref[...]
    q_ref[...] = (q * scale).astype(q_ref.dtype)                # fold 1/sqrt(Dh) into Q
    k = jnp.dot(x, wk_ref[...], preferred_element_type=jnp.float32) + bk_ref[...]
    k_ref[...] = k.astype(k_ref.dtype)
    v = jnp.dot(x, wv_ref[...], preferred_element_type=jnp.float32) + bv_ref[...]
    v_ref[...] = v.astype(v_ref.dtype)


def _qkv_projection(x, wq, wk, wv, bq, bk, bv, *, scale):
    M, E = x.shape
    itemsize = x.dtype.itemsize
    tm = _fit(M, 256, _sublane(itemsize))
    tn = _proj_col_tile(E, E, 3, itemsize)
    # Grid order: weight-column tiles OUTER, row tiles INNER.  The weight index_map
    # is invariant along the inner axis, so each (E, tn) weight tile is read from HBM
    # exactly once and stays resident while the row tiles stream past it.
    grid = (E // tn, M // tm)
    out_sd = jax.ShapeDtypeStruct((M, E), x.dtype)
    x_spec = pl.BlockSpec((tm, E), lambda j, i: (i, 0))
    w_spec = pl.BlockSpec((E, tn), lambda j, i: (0, j))
    b_spec = pl.BlockSpec((1, tn), lambda j, i: (0, j))
    o_spec = pl.BlockSpec((tm, tn), lambda j, i: (i, j))
    return pl.pallas_call(
        functools.partial(_qkv_kernel, scale=scale),
        out_shape=(out_sd, out_sd, out_sd),
        grid_spec=pltpu.PrefetchScalarGridSpec(
            num_scalar_prefetch=0,
            grid=grid,
            in_specs=[x_spec, w_spec, w_spec, w_spec, b_spec, b_spec, b_spec],
            out_specs=(o_spec, o_spec, o_spec),
        ),
        compiler_params=pltpu.CompilerParams(
            dimension_semantics=("parallel", "parallel"),
            vmem_limit_bytes=_VMEM_LIMIT_BYTES,
        ),
    )(x, wq, wk, wv, bq, bk, bv)


# ---------------------------------------------------------------------------
# 2) Flash-style causal attention over (B*H, T, D) head-major tensors.
# ---------------------------------------------------------------------------
def _head_group(BH, D):
    """Heads processed per flash grid step (batched dot over a leading group dim).
    Amortizes the ~0.35us per-step overhead and enlarges K/V DMAs; scratch stays tiny."""
    limit = max(1, 512 // max(D, 1))
    g = 1
    for cand in range(1, min(BH, limit) + 1):
        if BH % cand == 0:
            g = cand
    return g


def _flash_kernel(q_ref, k_ref, v_ref, o_ref, m_sc, l_sc, acc_sc):
    qi = pl.program_id(1)
    ki = pl.program_id(2)
    tq = q_ref.shape[1]
    tk = k_ref.shape[1]
    q_start = qi * tq
    kv_start = ki * tk

    @pl.when(ki == 0)
    def _():
        m_sc[...] = jnp.full(m_sc.shape, -jnp.inf, jnp.float32)
        l_sc[...] = jnp.zeros(l_sc.shape, jnp.float32)
        acc_sc[...] = jnp.zeros(acc_sc.shape, jnp.float32)

    def scores():
        # (G, tq, D) x (G, tk, D) contracted on D -> (G, tq, tk); no explicit K transpose.
        return jax.lax.dot_general(
            q_ref[...], k_ref[...], (((2,), (2,)), ((0,), (0,))),
            preferred_element_type=jnp.float32)

    def online_update(s):
        m_prev = m_sc[...]
        m_new = jnp.maximum(m_prev, s.max(axis=-1, keepdims=True))
        alpha = jnp.exp(m_prev - m_new)
        p = jnp.exp(s - m_new)
        l_sc[...] = alpha * l_sc[...] + p.sum(axis=-1, keepdims=True)
        acc_sc[...] = alpha * acc_sc[...] + jax.lax.dot_general(
            p.astype(v_ref.dtype), v_ref[...], (((2,), (1,)), ((0,), (0,))),
            preferred_element_type=jnp.float32)
        m_sc[...] = m_new

    # Interior tile fully below the causal diagonal: no mask work at all.
    @pl.when(kv_start + tk - 1 <= q_start)
    def _():
        online_update(scores())

    # Diagonal-straddling tile: build/apply the causal mask only here.
    @pl.when(jnp.logical_and(kv_start + tk - 1 > q_start,
                             kv_start <= q_start + tq - 1))
    def _():
        s = scores()
        row = q_start + jax.lax.broadcasted_iota(jnp.int32, s.shape, 1)
        col = kv_start + jax.lax.broadcasted_iota(jnp.int32, s.shape, 2)
        online_update(jnp.where(col <= row, s, -jnp.inf))

    # Tiles fully above the diagonal: compute skipped; their K/V DMA is also elided
    # by the clamped index_map in the wrapper.

    @pl.when(ki == pl.num_programs(2) - 1)
    def _():
        inv_l = pl.reciprocal(l_sc[...], approx=True)   # EUP slot, off the VALU path
        o_ref[...] = (acc_sc[...] * inv_l).astype(o_ref.dtype)


def _flash_attention(q, k, v, *, tq=256, tk=512):
    BH, T, D = q.shape
    tq = _fit(T, tq, 128)      # lane-dense (tq, tk) score tiles where T allows
    tk = _fit(T, tk, 128)
    g = _head_group(BH, D)
    grid = (BH // g, T // tq, T // tk)

    def q_map(b, qi, ki):
        return (b, qi, 0)

    def kv_map(b, qi, ki):
        # Clamp fully-masked (above-diagonal) KV tiles to the last needed tile so the
        # already-resident block is reused and no HBM DMA is issued for them.
        last_needed = ((qi + 1) * tq - 1) // tk
        return (b, jnp.minimum(ki, last_needed), 0)

    return pl.pallas_call(
        _flash_kernel,
        out_shape=jax.ShapeDtypeStruct((BH, T, D), q.dtype),
        grid_spec=pltpu.PrefetchScalarGridSpec(
            num_scalar_prefetch=0,
            grid=grid,
            in_specs=[
                pl.BlockSpec((g, tq, D), q_map),
                pl.BlockSpec((g, tk, D), kv_map),
                pl.BlockSpec((g, tk, D), kv_map),
            ],
            out_specs=pl.BlockSpec((g, tq, D), q_map),
            scratch_shapes=[
                pltpu.VMEM((g, tq, 1), jnp.float32),   # running max m
                pltpu.VMEM((g, tq, 1), jnp.float32),   # running denominator l
                pltpu.VMEM((g, tq, D), jnp.float32),   # output accumulator
            ],
        ),
        compiler_params=pltpu.CompilerParams(
            dimension_semantics=("parallel", "parallel", "arbitrary"),
            vmem_limit_bytes=_VMEM_LIMIT_BYTES,
        ),
    )(q, k, v)


# ---------------------------------------------------------------------------
# 3) Output projection: tiled matmul + bias (weight tiles resident, rows stream).
# ---------------------------------------------------------------------------
def _linear_kernel(x_ref, w_ref, b_ref, o_ref):
    o_ref[...] = (jnp.dot(x_ref[...], w_ref[...],
                          preferred_element_type=jnp.float32)
                  + b_ref[...]).astype(o_ref.dtype)


def _linear(x, w, b):
    M, K = x.shape
    N = w.shape[1]
    itemsize = x.dtype.itemsize
    tm = _fit(M, 256, _sublane(itemsize))
    tn = _proj_col_tile(K, N, 1, max(itemsize, w.dtype.itemsize))
    grid = (N // tn, M // tm)   # weight-column tiles outer -> weight resident
    return pl.pallas_call(
        _linear_kernel,
        out_shape=jax.ShapeDtypeStruct((M, N), x.dtype),
        grid_spec=pltpu.PrefetchScalarGridSpec(
            num_scalar_prefetch=0,
            grid=grid,
            in_specs=[
                pl.BlockSpec((tm, K), lambda j, i: (i, 0)),
                pl.BlockSpec((K, tn), lambda j, i: (0, j)),
                pl.BlockSpec((1, tn), lambda j, i: (0, j)),
            ],
            out_specs=pl.BlockSpec((tm, tn), lambda j, i: (i, j)),
        ),
        compiler_params=pltpu.CompilerParams(
            dimension_semantics=("parallel", "parallel"),
            vmem_limit_bytes=_VMEM_LIMIT_BYTES,
        ),
    )(x, w, b)


# ---------------------------------------------------------------------------
# Top-level forward (matches MultiHeadAttention.forward).
# ---------------------------------------------------------------------------
def multi_head_attention(x, wq, wk, wv, wo, bq, bk, bv, bo, *, n_heads):
    B, T, E = x.shape
    H = n_heads
    D = E // H
    M = B * T

    x2 = x.reshape(M, E)
    q, k, v = _qkv_projection(x2, wq, wk, wv, bq, bk, bv, scale=D ** -0.5)

    # Head-major layout (B*H, T, D): the head dim is the full lane extent of each
    # block, so the attention kernel never slices sub-128 chunks off the lane axis.
    def to_heads(t):
        return t.reshape(B, T, H, D).transpose(0, 2, 1, 3).reshape(B * H, T, D)

    att = _flash_attention(to_heads(q), to_heads(k), to_heads(v))      # (B*H, T, D)
    att = att.reshape(B, H, T, D).transpose(0, 2, 1, 3).reshape(M, E)  # head order kept

    out = _linear(att, wo, bo)                                         # (M, E)
    return out.reshape(B, T, E)


def reference(x, wq, wk, wv, wo, bq, bk, bv, bo, n_heads):
    """Pure-JAX reference mirroring the PyTorch forward exactly."""
    B, T, E = x.shape
    D = E // n_heads
    q = (x @ wq + bq).reshape(B, T, n_heads, D).transpose(0, 2, 1, 3)
    k = (x @ wk + bk).reshape(B, T, n_heads, D).transpose(0, 2, 1, 3)
    v = (x @ wv + bv).reshape(B, T, n_heads, D).transpose(0, 2, 1, 3)
    s = jnp.einsum("bhtd,bhsd->bhts", q, k) * (D ** -0.5)
    mask = jnp.tril(jnp.ones((T, T)))[None, None]
    s = jnp.where(mask == 0, -jnp.inf, s)
    p = jax.nn.softmax(s, axis=-1)
    o = jnp.einsum("bhts,bhsd->bhtd", p, v)
    o = o.transpose(0, 2, 1, 3).reshape(B, T, E)
    return o @ wo + bo


if __name__ == "__main__":
    B, T, E, H = 2, 8, 32, 4   # batch, block_size (seq), n_embed, n_heads

    key = jax.random.PRNGKey(0)
    kx, kq, kk, kv, ko, kbq, kbk, kbv, kbo = jax.random.split(key, 9)

    x = jax.random.normal(kx, (B, T, E), dtype=jnp.float32)

    # Deterministic parameter init (nn.Linear-style scale ~ 1/sqrt(E)).
    s = 1.0 / (E ** 0.5)
    wq = jax.random.uniform(kq, (E, E), jnp.float32, -s, s)
    wk = jax.random.uniform(kk, (E, E), jnp.float32, -s, s)
    wv = jax.random.uniform(kv, (E, E), jnp.float32, -s, s)
    wo = jax.random.uniform(ko, (E, E), jnp.float32, -s, s)
    bq = jax.random.uniform(kbq, (1, E), jnp.float32, -s, s)
    bk = jax.random.uniform(kbk, (1, E), jnp.float32, -s, s)
    bv = jax.random.uniform(kbv, (1, E), jnp.float32, -s, s)
    bo = jax.random.uniform(kbo, (1, E), jnp.float32, -s, s)

    out = multi_head_attention(x, wq, wk, wv, wo, bq, bk, bv, bo, n_heads=H)
    out = jax.block_until_ready(out)

    ref = reference(x, wq, wk, wv, wo, bq, bk, bv, bo, H)
    assert out.shape == (B, T, E)
    # Tolerance covers the approximate (EUP) reciprocal in the softmax epilogue.
    assert jnp.allclose(out, ref, atol=2e-3, rtol=2e-3), "mismatch vs reference"

    print("KERNEL_OK")
</pallas_src>

<mosaic_0001>
module attributes {stable_mosaic.version = 11 : i64} {
  func.func @_qkv_kernel(%arg0: i32, %arg1: i32, %arg2: memref<16x32xf32, #tpu.memory_space<vmem>>, %arg3: memref<32x32xf32, #tpu.memory_space<vmem>>, %arg4: memref<32x32xf32, #tpu.memory_space<vmem>>, %arg5: memref<32x32xf32, #tpu.memory_space<vmem>>, %arg6: memref<1x32xf32, #tpu.memory_space<vmem>>, %arg7: memref<1x32xf32, #tpu.memory_space<vmem>>, %arg8: memref<1x32xf32, #tpu.memory_space<vmem>>, %arg9: memref<16x32xf32, #tpu.memory_space<vmem>>, %arg10: memref<16x32xf32, #tpu.memory_space<vmem>>, %arg11: memref<16x32xf32, #tpu.memory_space<vmem>>) attributes {dimension_semantics = [#tpu.dimension_semantics<parallel>, #tpu.dimension_semantics<parallel>], iteration_bounds = array<i64: 1, 1>, scalar_prefetch = 0 : i64, scratch_operands = 0 : i64, tpu.core_type = #tpu.core_type<tc>, window_params = [{transform_indices = @transform_0, window_bounds = array<i64: 16, 32>}, {transform_indices = @transform_1, window_bounds = array<i64: 32, 32>}, {transform_indices = @transform_2, window_bounds = array<i64: 32, 32>}, {transform_indices = @transform_3, window_bounds = array<i64: 32, 32>}, {transform_indices = @transform_4, window_bounds = array<i64: 1, 32>}, {transform_indices = @transform_5, window_bounds = array<i64: 1, 32>}, {transform_indices = @transform_6, window_bounds = array<i64: 1, 32>}, {transform_indices = @transform_7, window_bounds = array<i64: 16, 32>}, {transform_indices = @transform_8, window_bounds = array<i64: 16, 32>}, {transform_indices = @transform_9, window_bounds = array<i64: 16, 32>}]} {
    %c0 = arith.constant 0 : index
    %c0_0 = arith.constant 0 : index
    %0 = vector.load %arg2[%c0, %c0_0] : memref<16x32xf32, #tpu.memory_space<vmem>>, vector<16x32xf32>
    %c0_1 = arith.constant 0 : index
    %c0_2 = arith.constant 0 : index
    %1 = vector.load %arg3[%c0_1, %c0_2] : memref<32x32xf32, #tpu.memory_space<vmem>>, vector<32x32xf32>
    %cst = arith.constant dense<0.000000e+00> : vector<16x32xf32>
    %2 = tpu.matmul %0, %1, %cst {dimension_numbers = #tpu.dot_dimension_numbers<[1], [0], [0], [1], [0, 0, 1, 1], [], []>} : vector<16x32xf32>, vector<32x32xf32>, vector<16x32xf32> -> vector<16x32xf32>
    %c0_3 = arith.constant 0 : index
    %c0_4 = arith.constant 0 : index
    %3 = vector.load %arg6[%c0_3, %c0_4] : memref<1x32xf32, #tpu.memory_space<vmem>>, vector<1x32xf32>
    %4 = vector.broadcast %3 : vector<1x32xf32> to vector<16x32xf32>
    %5 = arith.addf %2, %4 : vector<16x32xf32>
    %cst_5 = arith.constant 0.353553385 : f32
    %6 = vector.broadcast %cst_5 : f32 to vector<16x32xf32>
    %7 = arith.mulf %5, %6 : vector<16x32xf32>
    %c0_6 = arith.constant 0 : index
    %c0_7 = arith.constant 0 : index
    %8 = vector.load %arg9[%c0_6, %c0_7] : memref<16x32xf32, #tpu.memory_space<vmem>>, vector<16x32xf32>
    tpu.vector_store %arg9[%c0_6, %c0_7], %7 {strides = array<i32>} : memref<16x32xf32, #tpu.memory_space<vmem>>, vector<16x32xf32>,
    %c0_8 = arith.constant 0 : index
    %c0_9 = arith.constant 0 : index
    %9 = vector.load %arg4[%c0_8, %c0_9] : memref<32x32xf32, #tpu.memory_space<vmem>>, vector<32x32xf32>
    %cst_10 = arith.constant dense<0.000000e+00> : vector<16x32xf32>
    %10 = tpu.matmul %0, %9, %cst_10 {dimension_numbers = #tpu.dot_dimension_numbers<[1], [0], [0], [1], [0, 0, 1, 1], [], []>} : vector<16x32xf32>, vector<32x32xf32>, vector<16x32xf32> -> vector<16x32xf32>
    %c0_11 = arith.constant 0 : index
    %c0_12 = arith.constant 0 : index
    %11 = vector.load %arg7[%c0_11, %c0_12] : memref<1x32xf32, #tpu.memory_space<vmem>>, vector<1x32xf32>
    %12 = vector.broadcast %11 : vector<1x32xf32> to vector<16x32xf32>
    %13 = arith.addf %10, %12 : vector<16x32xf32>
    %c0_13 = arith.constant 0 : index
    %c0_14 = arith.constant 0 : index
    %14 = vector.load %arg10[%c0_13, %c0_14] : memref<16x32xf32, #tpu.memory_space<vmem>>, vector<16x32xf32>
    tpu.vector_store %arg10[%c0_13, %c0_14], %13 {strides = array<i32>} : memref<16x32xf32, #tpu.memory_space<vmem>>, vector<16x32xf32>,
    %c0_15 = arith.constant 0 : index
    %c0_16 = arith.constant 0 : index
    %15 = vector.load %arg5[%c0_15, %c0_16] : memref<32x32xf32, #tpu.memory_space<vmem>>, vector<32x32xf32>
    %cst_17 = arith.constant dense<0.000000e+00> : vector<16x32xf32>
    %16 = tpu.matmul %0, %15, %cst_17 {dimension_numbers = #tpu.dot_dimension_numbers<[1], [0], [0], [1], [0, 0, 1, 1], [], []>} : vector<16x32xf32>, vector<32x32xf32>, vector<16x32xf32> -> vector<16x32xf32>
    %c0_18 = arith.constant 0 : index
    %c0_19 = arith.constant 0 : index
    %17 = vector.load %arg8[%c0_18, %c0_19] : memref<1x32xf32, #tpu.memory_space<vmem>>, vector<1x32xf32>
    %18 = vector.broadcast %17 : vector<1x32xf32> to vector<16x32xf32>
    %19 = arith.addf %16, %18 : vector<16x32xf32>
    %c0_20 = arith.constant 0 : index
    %c0_21 = arith.constant 0 : index
    %20 = vector.load %arg11[%c0_20, %c0_21] : memref<16x32xf32, #tpu.memory_space<vmem>>, vector<16x32xf32>
    tpu.vector_store %arg11[%c0_20, %c0_21], %19 {strides = array<i32>} : memref<16x32xf32, #tpu.memory_space<vmem>>, vector<16x32xf32>,
    return
  }
  func.func @transform_0(%arg0: i32, %arg1: i32) -> (i32, i32) {
    %c0_i32 = arith.constant 0 : i32
    %c0_i32_0 = arith.constant 0 : i32
    return %arg1, %c0_i32 : i32, i32
  }
  func.func @transform_1(%arg0: i32, %arg1: i32) -> (i32, i32) {
    %c0_i32 = arith.constant 0 : i32
    %c0_i32_0 = arith.constant 0 : i32
    return %c0_i32, %arg0 : i32, i32
  }
  func.func @transform_2(%arg0: i32, %arg1: i32) -> (i32, i32) {
    %c0_i32 = arith.constant 0 : i32
    %c0_i32_0 = arith.constant 0 : i32
    return %c0_i32, %arg0 : i32, i32
  }
  func.func @transform_3(%arg0: i32, %arg1: i32) -> (i32, i32) {
    %c0_i32 = arith.constant 0 : i32
    %c0_i32_0 = arith.constant 0 : i32
    return %c0_i32, %arg0 : i32, i32
  }
  func.func @transform_4(%arg0: i32, %arg1: i32) -> (i32, i32) {
    %c0_i32 = arith.constant 0 : i32
    %c0_i32_0 = arith.constant 0 : i32
    return %c0_i32, %arg0 : i32, i32
  }
  func.func @transform_5(%arg0: i32, %arg1: i32) -> (i32, i32) {
    %c0_i32 = arith.constant 0 : i32
    %c0_i32_0 = arith.constant 0 : i32
    return %c0_i32, %arg0 : i32, i32
  }
  func.func @transform_6(%arg0: i32, %arg1: i32) -> (i32, i32) {
    %c0_i32 = arith.constant 0 : i32
    %c0_i32_0 = arith.constant 0 : i32
    return %c0_i32, %arg0 : i32, i32
  }
  func.func @transform_7(%arg0: i32, %arg1: i32) -> (i32, i32) {
    %c0_i32 = arith.constant 0 : i32
    return %arg1, %arg0 : i32, i32
  }
  func.func @transform_8(%arg0: i32, %arg1: i32) -> (i32, i32) {
    %c0_i32 = arith.constant 0 : i32
    return %arg1, %arg0 : i32, i32
  }
  func.func @transform_9(%arg0: i32, %arg1: i32) -> (i32, i32) {
    %c0_i32 = arith.constant 0 : i32
    return %arg1, %arg0 : i32, i32
  }
}

</mosaic_0001>

<bundles_post_ra>
// kernel: tpu_custom_call.1
= control target key start
LH: loop header
LB: loop body
LE: loop exit
PB: predicated region body
PF: predicated region fallthrough
CT: control target
= control target key end

     0   :  { %15 = vsyncpa [#allocation3], 0  ;;  %s877_s0 = inlined_call_operand.hbm [shape: f32[16,32], index: 0, kind: input, shape index: {}]   ;;  %s878_s1 = inlined_call_operand.hbm [shape: f32[32,32], index: 1, kind: input, shape index: {}]   ;;  %s879_s2 = inlined_call_operand.hbm [shape: f32[32,32], index: 2, kind: input, shape index: {}]   ;;  %s880_s3 = inlined_call_operand.hbm [shape: f32[32,32], index: 3, kind: input, shape index: {}]   ;;  %s881_s4 = inlined_call_operand.vmem [shape: f32[1,32], index: 4, kind: input, shape index: {}]   ;;  %s882_s5 = inlined_call_operand.vmem [shape: f32[1,32], index: 5, kind: input, shape index: {}]   ;;  %s883_s6 = inlined_call_operand.vmem [shape: f32[1,32], index: 6, kind: input, shape index: {}]   ;;  %s884_s7 = inlined_call_operand.hbm [shape: f32[16,32], index: 7, kind: output, shape index: {0}]   ;;  %s885_s8 = inlined_call_operand.hbm [shape: f32[16,32], index: 8, kind: output, shape index: {1}]   ;;  %s886_s9 = inlined_call_operand.hbm [shape: f32[16,32], index: 9, kind: output, shape index: {2}]  }
   0x1   :  { %16 = vsyncpa [#allocation6], 0 }
   0x2   :  { %17 = vsyncpa [#allocation9], 0 }
   0x3   :  { %18 = vsyncpa [#allocation4], 0 }
   0x4   :  { %19 = vsyncpa [#allocation12], 0  ;;  %s668_s30 = smov [#allocation5]   ;;  %s669_s11 = smov [#allocation2]  }
   0x5   :  { %s37_s10 = sshll.u32 %s668_s30, 4  ;;  %s25_s12 = sshll.u32 %s669_s11, 4  ;;  %s38_s10 = int_to_ptr.vmem [resolvable:$true] %s37_s10  ;;  %s727_s12 = int_to_ptr.vmem [resolvable:$true] %s25_s12 }
   0x6   :  { %s504_s15 = scalar_lea.hbm %s878_s1, 512 }
   0x7   :  { %p505_p0 = scmp.ne.s32.totalorder %s878_s1, %s504_s15  ;;  %p508_p1 = scmp.lt.u32.totalorder %s504_s15, %s878_s1 }
   0x9   :  { %p510_p2 = pnand %p508_p1, %p505_p0 }
   0xb   :  { %513 = shalt.err (!%p510_p2)
}
   0xc   :  { %s514_s20 = scalar_lea.vmem %s38_s10, 512  ;;  %p519_p4 = scmp.lt.s32.totalorder %s38_s10, %s38_s10 }
   0xd   :  { %p515_p3 = scmp.ne.s32.totalorder %s38_s10, %s514_s20  ;;  %p520_p5 = scmp.lt.s32.totalorder %s514_s20, %s514_s20 }
   0xf   :  { %p521_p6 = por %p520_p5, %p519_p4 }
  0x11   :  { %p522_p7 = pnand %p521_p6, %p515_p3 }
  0x13   :  { %525 = shalt.err (!%p522_p7)
}
  0x14   :  { %s670_s21 = smov 128   ;;  %s671_s22 = smov 8  }
  0x15   :  { %43 = dma.hbm_to_vmem [thread:$0]  %s878_s1, 512, %s38_s10, [#allocation6], %s670_s21, %s670_s21, %s671_s22  }
  0x16   :  { %s526_s27 = scalar_lea.hbm %s877_s0, 256 }
  0x17   :  { %p527_p8 = scmp.ne.s32.totalorder %s877_s0, %s526_s27  ;;  %p530_p9 = scmp.lt.u32.totalorder %s526_s27, %s877_s0 }
  0x19   :  { %p532_p10 = pnand %p530_p9, %p527_p8 }
  0x1b   :  { %535 = shalt.err (!%p532_p10)
}
  0x1c   :  { %s536_s13 = scalar_lea.vmem %s727_s12, 256  ;;  %p541_p12 = scmp.lt.s32.totalorder %s727_s12, %s727_s12 }
  0x1d   :  { %p537_p11 = scmp.ne.s32.totalorder %s727_s12, %s536_s13  ;;  %p542_p13 = scmp.lt.s32.totalorder %s536_s13, %s536_s13 }
  0x1f   :  { %p543_p0 = por %p542_p13, %p541_p12 }
  0x21   :  { %p544_p1 = pnand %p543_p0, %p537_p11 }
  0x23   :  { %547 = shalt.err (!%p544_p1)
}
  0x24   :  { %31 = dma.hbm_to_vmem [thread:$0]  %s877_s0, 256, %s727_s12, [#allocation3], %s670_s21, %s670_s21, %s671_s22  }
  0x25   :  { %s672_s14 = smov [#allocation7]   ;;  %s673_s16 = smov [#allocation8]  }
  0x26   :  { %s49_s15 = sshll.u32 %s672_s14, 4  ;;  %s61_s17 = sshll.u32 %s673_s16, 4  ;;  %s50_s15 = int_to_ptr.vmem [resolvable:$true] %s49_s15  ;;  %s764_s17 = int_to_ptr.vmem [resolvable:$true] %s61_s17 }
  0x27   :  { %s548_s20 = scalar_lea.hbm %s879_s2, 512 }
  0x28   :  { %p549_p2 = scmp.ne.s32.totalorder %s879_s2, %s548_s20  ;;  %p552_p3 = scmp.lt.u32.totalorder %s548_s20, %s879_s2 }
  0x2a   :  { %p554_p4 = pnand %p552_p3, %p549_p2 }
  0x2c   :  { %557 = shalt.err (!%p554_p4)
}
  0x2d   :  { %s558_s0 = scalar_lea.vmem %s50_s15, 512  ;;  %p563_p6 = scmp.lt.s32.totalorder %s50_s15, %s50_s15 }
  0x2e   :  { %p559_p5 = scmp.ne.s32.totalorder %s50_s15, %s558_s0  ;;  %p564_p7 = scmp.lt.s32.totalorder %s558_s0, %s558_s0 }
  0x30   :  { %p565_p8 = por %p564_p7, %p563_p6 }
  0x32   :  { %p566_p9 = pnand %p565_p8, %p559_p5 }
  0x34   :  { %569 = shalt.err (!%p566_p9)
}
  0x35   :  { %55 = dma.hbm_to_vmem [thread:$0]  %s879_s2, 512, %s50_s15, [#allocation6], %s670_s21, %s670_s21, %s671_s22  }
  0x36   :  { %s570_s30 = scalar_lea.hbm %s880_s3, 512 }
  0x37   :  { %p571_p10 = scmp.ne.s32.totalorder %s880_s3, %s570_s30  ;;  %p574_p11 = scmp.lt.u32.totalorder %s570_s30, %s880_s3 }
  0x39   :  { %p576_p12 = pnand %p574_p11, %p571_p10 }
  0x3b   :  { %579 = shalt.err (!%p576_p12)
}
  0x3c   :  { %s580_s14 = scalar_lea.vmem %s764_s17, 512  ;;  %p585_p0 = scmp.lt.s32.totalorder %s764_s17, %s764_s17 }
  0x3d   :  { %p581_p13 = scmp.ne.s32.totalorder %s764_s17, %s580_s14  ;;  %p586_p1 = scmp.lt.s32.totalorder %s580_s14, %s580_s14 }
  0x3f   :  { %p587_p2 = por %p586_p1, %p585_p0 }
  0x41   :  { %p588_p3 = pnand %p587_p2, %p581_p13 }
  0x43   :  { %591 = shalt.err (!%p588_p3)
}
  0x44   :  { %67 = dma.hbm_to_vmem [thread:$0]  %s880_s3, 512, %s764_s17, [#allocation9], %s670_s21, %s670_s21, %s671_s22  }
  0x45   :  { %658 = dma.done.wait [#allocation3], 256  }
  0x46   :  { %659 = vsyncadd [#allocation3], 4294967040 }
  0x47   :  { %660 = dma.done.wait [#allocation6], 1024  }
  0x48   :  { %661 = vsyncadd [#allocation6], 4294966272 }
  0x49   :  { %662 = dma.done.wait [#allocation9], 512  }
  0x4a   :  { %663 = vsyncadd [#allocation9], 4294966784  ;;  %v88_v0 = vld [vmem:[#allocation5] sm:$0xff]  ;;  %v89_v1 = vld [vmem:[#allocation5 + $0x8] sm:$0xff]  ;;  %vm99_vm0 = vcmask 261120   ;;  %s674_s19 = smov [#allocation11]  }
  0x4b   :  { %v90_v2 = vld [vmem:[#allocation5 + $0x10] sm:$0xff]  ;;  %v471_v3 = vpack.c.bf16 %v89_v1, %v88_v0  ;;  %v91_v4 = vld [vmem:[#allocation5 + $0x18] sm:$0xff]  ;;  %v185_v5 = vld [vmem:[#allocation7] sm:$0xff]  ;;  %s378_s20 = sshll.u32 %s674_s19, 4  ;;  %s675_s23 = smov [#allocation10]   ;;  %s379_s20 = int_to_ptr.vmem [resolvable:$true] %s378_s20 }
  0x4c   :  { %v186_v6 = vld [vmem:[#allocation7 + $0x8] sm:$0xff]  ;;  %v475_v7 = vpack.c.bf16 %v91_v4, %v90_v2  ;;  %v86_v9 = vld [vmem:[#allocation2] sm:$0xff]  ;;  %v273_v10 = vld [vmem:[#allocation8] sm:$0xff]  ;;  %s366_s24 = sshll.u32 %s675_s23, 4  ;;  %s676_s25 = smov [#allocation13]   ;;  %s814_s24 = int_to_ptr.vmem [resolvable:$true] %s366_s24 }
  0x4d   :  { %v479_v8 = vpack.c.bf16 %v186_v6, %v185_v5  ;;  %472 = vmatprep.subr.bf16.mxu0 %v471_v3  ;;  %446 = vmatprep.mubr.msk.f32.mxu0 %vm99_vm0, %v86_v9  ;;  %v274_v11 = vld [vmem:[#allocation8 + $0x8] sm:$0xff]  ;;  %v187_v12 = vld [vmem:[#allocation7 + $0x10] sm:$0xff]  ;;  %v188_v13 = vld [vmem:[#allocation7 + $0x18] sm:$0xff]  ;;  %s821_s26 = sshll.u32 %s676_s25, 4  ;;  %s592_s0 = scalar_lea.vmem %s379_s20, 256  ;;  %s391_s26 = int_to_ptr.vmem [resolvable:$true] %s821_s26 }
  0x4e   :  { %474 = vmatpush3.bf16.msra.mxu0 %v471_v3  ;;  %v483_v14 = vpack.c.bf16 %v188_v13, %v187_v12  ;;  %v487_v15 = vpack.c.bf16 %v274_v11, %v273_v10  ;;  %v275_v16 = vld [vmem:[#allocation8 + $0x10] sm:$0xff]  ;;  %v276_v17 = vld [vmem:[#allocation8 + $0x18] sm:$0xff]  ;;  %457 = vmatprep.mubr.msk.f32.mxu1 %vm99_vm0, %v86_v9  ;;  %p593_p4 = scmp.ne.s32.totalorder %s379_s20, %s592_s0  ;;  %p597_p5 = scmp.lt.s32.totalorder %s379_s20, %s379_s20 }
  0x4f   :  { %480 = vmatprep.subr.bf16.mxu1 %v479_v8  ;;  %476 = vmatprep.subr.bf16.mxu0 %v475_v7  ;;  %v87_v18 = vld [vmem:[#allocation2 + $0x8] sm:$0xff]  ;;  %v491_v19 = vpack.c.bf16 %v276_v17, %v275_v16  ;;  %v411_v20 = vld [vmem:[%s881_s4] ss:$0 sm:$0xff]  ;;  %p598_p6 = scmp.lt.s32.totalorder %s592_s0, %s592_s0 }
  0x50   :  { %482 = vmatpush3.bf16.msra.mxu1 %v479_v8  ;;  %v414_v21 = vld [vmem:[%s882_s5] ss:$0 sm:$0xff] }
  0x51   :  { %484 = vmatprep.subr.bf16.mxu1 %v483_v14  ;;  %v417_v32 = vld [vmem:[%s883_s6] ss:$0 sm:$0xff]  ;;  %p599_p7 = por %p598_p6, %p597_p5 }
  0x52   :  { %478 = vmatpush3.bf16.msra.mxu0 %v475_v7 }
  0x53   :  { %488 = vmatprep.subr.bf16.mxu0 %v487_v15  ;;  %p600_p8 = pnand %p599_p7, %p593_p4 }
  0x54   :  { %486 = vmatpush3.bf16.msra.mxu1 %v483_v14 }
  0x55   :  { %447 = vmatmul.mubr.msk.f32.vlgmr.msra.gmra.mrb[0].mxu0 %vm99_vm0, %v87_v18 }
  0x56   :  { %490 = vmatpush3.bf16.msra.mxu0 %v487_v15  ;;  %468 = vmatprep.mubr.msk.f32.mxu0 %vm99_vm0, %v86_v9 }
  0x57   :  { %458 = vmatmul.mubr.msk.f32.vlgmr.msra.gmra.mrb[0].mxu1 %vm99_vm0, %v87_v18  ;;  %492 = vmatprep.subr.bf16.mxu0 %v491_v19 }
  0x5a   :  { %494 = vmatpush3.bf16.msra.mxu0 %v491_v19 }
  0x5d   :  { %469 = vmatmul.mubr.msk.f32.vlgmr.msra.gmra.mrb[2].mxu0 %vm99_vm0, %v87_v18 }
 0x128   :  { %v448_v22 = vpop.f32.mrb[0].mxu0 }
 0x129   :  { %v178_v23 = vadd.f32 %v448_v22, %v411_v20  ;;  %v172_v24 = vpop.f32.mrb[1].mxu0 }
 0x12a   :  { %v459_v25 = vpop.f32.mrb[0].mxu1  ;;  %v173_v26 = vadd.f32 %v411_v20, %v172_v24 }
 0x12b   :  { %v268_v27 = vadd.f32 %v459_v25, %v414_v21  ;;  %v262_v28 = vpop.f32.mrb[1].mxu1  ;;  %v182_v29 = vmul.f32 0.35355338, %v178_v23 }
 0x12c   :  { %v263_v30 = vadd.f32 %v414_v21, %v262_v28  ;;  %v181_v31 = vmul.f32 0.35355338, %v173_v26 }
 0x12d   :  { %272 = vst.msk [vmem:[#allocation11 + $0x8] sm:$0xff] %vm99_vm0, %v268_v27  ;;  %184 = vst.msk [vmem:[#allocation10 + $0x8] sm:$0xff] %vm99_vm0, %v182_v29 }
 0x12e   :  { %271 = vst.msk [vmem:[#allocation11] sm:$0xff] %vm99_vm0, %v263_v30  ;;  %183 = vst.msk [vmem:[#allocation10] sm:$0xff] %vm99_vm0, %v181_v31 }
 0x12f   :  { %603 = shalt.err (!%p600_p8)
}
 0x130   :  { %s604_s28 = scalar_lea.hbm %s885_s8, 256 }
 0x131   :  { %p605_p9 = scmp.ne.s32.totalorder %s885_s8, %s604_s28  ;;  %p608_p10 = scmp.lt.u32.totalorder %s604_s28, %s885_s8 }
 0x133   :  { %p610_p11 = pnand %p608_p10, %p605_p9 }
 0x135   :  { %613 = shalt.err (!%p610_p11)
}
 0x136   :  { %384 = dma.vmem_to_hbm [thread:$0]  %s379_s20, 256, %s885_s8, [#allocation12], %s670_s21, %s670_s21, %s671_s22  }
 0x137   :  { %s614_s10 = scalar_lea.vmem %s814_s24, 256  ;;  %p619_p13 = scmp.lt.s32.totalorder %s814_s24, %s814_s24 }
 0x138   :  { %p615_p12 = scmp.ne.s32.totalorder %s814_s24, %s614_s10  ;;  %p620_p0 = scmp.lt.s32.totalorder %s614_s10, %s614_s10 }
 0x13a   :  { %p621_p1 = por %p620_p0, %p619_p13 }
 0x13c   :  { %p622_p2 = pnand %p621_p1, %p615_p12 }
 0x13e   :  { %625 = shalt.err (!%p622_p2)
}
 0x13f   :  { %s626_s15 = scalar_lea.hbm %s884_s7, 256 }
 0x140   :  { %p627_p3 = scmp.ne.s32.totalorder %s884_s7, %s626_s15  ;;  %p630_p4 = scmp.lt.u32.totalorder %s626_s15, %s884_s7 }
 0x142   :  { %p632_p5 = pnand %p630_p4, %p627_p3 }
 0x144   :  { %635 = shalt.err (!%p632_p5)
}
 0x145   :  { %372 = dma.vmem_to_hbm [thread:$0]  %s814_s24, 256, %s884_s7, [#allocation4], %s670_s21, %s670_s21, %s671_s22   ;;  %v470_v33 = vpop.f32.mrb[2].mxu0 }
 0x146   :  { %v356_v34 = vadd.f32 %v470_v33, %v417_v32  ;;  %v350_v35 = vpop.f32.mrb[3].mxu0  ;;  %s636_s20 = scalar_lea.vmem %s391_s26, 256  ;;  %p641_p7 = scmp.lt.s32.totalorder %s391_s26, %s391_s26 }
 0x147   :  { %v351_v36 = vadd.f32 %v417_v32, %v350_v35  ;;  %p637_p6 = scmp.ne.s32.totalorder %s391_s26, %s636_s20  ;;  %p642_p8 = scmp.lt.s32.totalorder %s636_s20, %s636_s20 }
 0x148   :  { %360 = vst.msk [vmem:[#allocation13 + $0x8] sm:$0xff] %vm99_vm0, %v356_v34 }
 0x149   :  { %359 = vst.msk [vmem:[#allocation13] sm:$0xff] %vm99_vm0, %v351_v36  ;;  %p643_p9 = por %p642_p8, %p641_p7 }
 0x14b   :  { %p644_p10 = pnand %p643_p9, %p637_p6 }
 0x14d   :  { %647 = shalt.err (!%p644_p10)
}
 0x14e   :  { %s648_s7 = scalar_lea.hbm %s886_s9, 256 }
 0x14f   :  { %p649_p11 = scmp.ne.s32.totalorder %s886_s9, %s648_s7  ;;  %p652_p12 = scmp.lt.u32.totalorder %s648_s7, %s886_s9 }
 0x151   :  { %p654_p13 = pnand %p652_p12, %p649_p11 }
 0x153   :  { %657 = shalt.err (!%p654_p13)
}
 0x154   :  { %396 = dma.vmem_to_hbm [thread:$0]  %s391_s26, 256, %s886_s9, [#allocation12], %s670_s21, %s670_s21, %s671_s22  }
 0x155   :  { %664 = dma.done.wait [#allocation4], 256  }
 0x156   :  { %665 = vsyncadd [#allocation4], 4294967040 }
 0x157   :  { %666 = dma.done.wait [#allocation12], 512  }
 0x158   :  { %667 = vsyncadd [#allocation12], 4294966784 }
 0x159   :  { %406 = vsyncpa [#allocation3], 1 }
 0x15a   :  { %407 = vsyncpa [#allocation6], 1 }
 0x15b   :  { %408 = vsyncpa [#allocation9], 1 }
 0x15c   :  { %409 = vsyncpa [#allocation4], 1 }
 0x15d   :  { %410 = vsyncpa [#allocation12], 1 }

</bundles_post_ra>
